<compile_context>
chip_gen: v7x
topology: tpu7x:2x2x1
jax: 0.10.0
libtpu: 0.0.40
codegen_flags: <defaults>
</compile_context>

<pallas_src>
import jax
import jax.numpy as jnp
from jax import lax
from jax.experimental import pallas as pl
from jax.experimental.pallas import tpu as pltpu


def _round_up(x, m):
    return -(-x // m) * m


# ---------------------------------------------------------------------------
# Path 1: VMEM-resident embedding table (table fits the VMEM budget, N >~ V/2).
# ---------------------------------------------------------------------------
def _make_vmem_table_kernel(tb, group, vocab):
    """Gather with the whole table resident in a single-buffered VMEM scratch.

    The table is filled once by a manual DMA on grid step 0 and reused by all
    later steps, so the grid axis must be 'arbitrary' (sequential, one core).
    """
    n_groups = tb // group

    def kernel(ids_ref, w_hbm, o_ref, table, fill_sem):
        # One-time fill: single VMEM copy of the table (no double buffering),
        # single V*D HBM read for the whole call.
        @pl.when(pl.program_id(0) == 0)
        def _():
            cp = pltpu.make_async_copy(w_hbm, table, fill_sem.at[0])
            cp.start()
            cp.wait()

        base = pl.program_id(0) * tb

        # Gather `group` rows (one sublane tile) at a time and write them back
        # as one dense (group, D) store instead of `group` masked 1-sublane
        # stores.
        # TODO(synk): replace the per-row loads with a true vectorized in-VMEM
        # gather (jnp.take -> tpu.dynamic_gather) where Mosaic supports it.
        def gather_group(g, carry):
            start = pl.multiple_of(g * group, group)
            rows = [
                table[pl.ds(jnp.clip(ids_ref[base + start + i], 0, vocab - 1), 1), :]
                for i in range(group)
            ]
            o_ref[pl.ds(start, group), :] = jnp.concatenate(rows, axis=0)
            return carry

        if n_groups > 0:
            lax.fori_loop(0, n_groups, gather_group, 0)

        # Static tail (only reached when tb < group, i.e. a tiny call).
        for i in range(n_groups * group, tb):
            tok = jnp.clip(ids_ref[base + i], 0, vocab - 1)
            o_ref[pl.ds(i, 1), :] = table[pl.ds(tok, 1), :]

    return kernel


# ---------------------------------------------------------------------------
# Path 2: row gather straight from the HBM-resident table via per-row DMAs.
# ---------------------------------------------------------------------------
def _make_hbm_gather_kernel(tb, nw, vocab):
    """Gather rows from HBM with up to `nw` async row-DMAs in flight.

    Used when the table does not fit the VMEM budget, or when the call is
    decode-sized (N << V) so reading only the needed rows (~N*D bytes) is far
    less HBM traffic than staging the whole V*D table.
    """

    def kernel(ids_ref, w_hbm, o_ref, row_buf, sem):
        base = pl.program_id(0) * tb

        def issue(t):
            tok = jnp.clip(ids_ref[base + t], 0, vocab - 1)
            pltpu.make_async_copy(
                w_hbm.at[pl.ds(tok, 1), :],
                row_buf.at[pl.ds(t, 1), :],
                sem.at[t % nw],
            ).start()

        def wait_for(t):
            # Shape-only descriptor for the wait (all row copies are (1, D)).
            pltpu.make_async_copy(
                w_hbm.at[pl.ds(0, 1), :],
                row_buf.at[pl.ds(t, 1), :],
                sem.at[t % nw],
            ).wait()

        def prime(t, c):
            issue(t)
            return c

        lax.fori_loop(0, nw, prime, 0)

        def steady(t, c):
            wait_for(t - nw)
            issue(t)
            return c

        lax.fori_loop(nw, tb, steady, 0)

        def drain(t, c):
            wait_for(t)
            return c

        lax.fori_loop(tb - nw, tb, drain, 0)

        # One dense (tb, D) store of the fully gathered block.
        o_ref[...] = row_buf[...]

    return kernel


# ---------------------------------------------------------------------------
# Wrapper: Embedder.forward
# ---------------------------------------------------------------------------
def embedder(ids, weight, *, mode="auto", block_tokens=None):
    """Pallas equivalent of Embedder.forward: weight[ids].

    ids    : integer token ids, any shape (e.g. (B, S))
    weight : (V, D) embedding table
    mode   : "auto" | "vmem" (force resident-table path) | "hbm" (force DMA gather)
    returns ids.shape + (D,), dtype = weight.dtype
    """
    assert mode in ("auto", "vmem", "hbm")
    V, D = weight.shape
    batch_shape = tuple(ids.shape)
    N = 1
    for s in batch_shape:
        N *= int(s)
    assert N > 0

    itemsize = jnp.dtype(weight.dtype).itemsize
    lane_d = _round_up(D, 128)                 # lane-padded feature width in VMEM
    row_bytes = lane_d * itemsize
    sub = max(8, 32 // itemsize)               # sublane tile rows: 8 f32 / 16 bf16 / 32 int8

    # ---- generation-aware VMEM budget -------------------------------------
    try:
        vmem_cap = int(pltpu.get_tpu_info().vmem_capacity_bytes)
    except Exception:
        vmem_cap = 64 * 1024 * 1024            # v7x per-core size; safe everywhere
    vmem_budget = int(vmem_cap * 0.70)         # headroom for Mosaic internals / out bufs
    vmem_limit = int(vmem_cap * 0.85)          # explicit scoped-VMEM limit (v5e default is 16 MiB)

    table_bytes = _round_up(V, sub) * row_bytes            # single resident copy
    fits_vmem = table_bytes + 2 * sub * row_bytes <= vmem_budget

    if mode == "vmem":
        if not fits_vmem:
            raise ValueError("embedding table does not fit the VMEM budget")
        use_vmem = True
    elif mode == "hbm":
        use_vmem = False
    else:
        # Staging the whole table only pays off when a decent fraction of it
        # is reused; decode-sized calls take the row-gather path.
        use_vmem = fits_vmem and (2 * N >= V)

    # ---- token block size (multiple of the dtype sublane tile) -------------
    if block_tokens is None:
        tb = max(sub, min(2048, (2 * 1024 * 1024) // row_bytes))  # ~2 MiB / block
    else:
        tb = max(1, int(block_tokens))
    if use_vmem:
        cap = max(sub, (vmem_budget - table_bytes) // (2 * row_bytes))
    else:
        cap = max(sub, vmem_budget // (3 * row_bytes))
    tb = min(tb, cap)
    tb = max(sub, (tb // sub) * sub)
    tb = min(tb, _round_up(N, sub))            # never larger than the rounded token count
    if tb > N and N < sub:
        tb = N                                  # tiny call: block == full output dim

    grid = pl.cdiv(N, tb)
    n_ids = grid * tb

    # NOTE: d_model that is not a multiple of 128 produces masked (partial-lane)
    # output stores; pad the table's feature dim to 128 upstream for peak BW.

    ids_flat = ids.reshape(N).astype(jnp.int32)
    if n_ids != N:
        # Padded ids gather row 0; padded output rows are sliced off below.
        ids_flat = jnp.pad(ids_flat, (0, n_ids - N))
    # TODO(synk): for very long sequences (N >~ 64K tokens) stream the ids per
    # block via a blocked SMEM in_spec instead of prefetching them all to SMEM.

    w_spec = pl.BlockSpec(memory_space=pl.ANY)              # table stays in HBM
    out_spec = pl.BlockSpec((tb, D), lambda g, ids: (g, 0))

    if use_vmem:
        kernel = _make_vmem_table_kernel(tb, sub, V)
        scratch = [
            pltpu.VMEM((V, D), weight.dtype),               # single-buffered resident table
            pltpu.SemaphoreType.DMA((1,)),
        ]
        # 'arbitrary': the table is filled once on step 0 and reused, so the
        # grid must run sequentially on one core (also avoids each megacore
        # half re-reading the full V*D table from HBM).
        semantics = ("arbitrary",)
        bytes_accessed = V * D * itemsize + n_ids * D * itemsize + n_ids * 4
    else:
        nw = min(8, tb)                                     # row DMAs kept in flight
        kernel = _make_hbm_gather_kernel(tb, nw, V)
        scratch = [
            pltpu.VMEM((tb, D), weight.dtype),              # gather staging buffer
            pltpu.SemaphoreType.DMA((nw,)),
        ]
        semantics = ("parallel",)                           # disjoint token blocks
        bytes_accessed = 2 * n_ids * D * itemsize + n_ids * 4

    out = pl.pallas_call(
        kernel,
        out_shape=jax.ShapeDtypeStruct((n_ids, D), weight.dtype),
        grid_spec=pltpu.PrefetchScalarGridSpec(
            num_scalar_prefetch=1,                          # ids -> SMEM
            grid=(grid,),
            in_specs=[w_spec],
            out_specs=out_spec,
            scratch_shapes=scratch,
        ),
        compiler_params=pltpu.CompilerParams(
            dimension_semantics=semantics,
            vmem_limit_bytes=vmem_limit,
        ),
        cost_estimate=pl.CostEstimate(
            flops=0, transcendentals=0, bytes_accessed=int(bytes_accessed)),
    )(ids_flat, weight)

    if n_ids != N:
        out = out[:N]                                       # only ragged tails pay this copy
    return out.reshape(*batch_shape, D)


if __name__ == "__main__":
    # Small shapes consistent with the module: batch=2, seq=8, d_model=32.
    B, S = 2, 8
    VOCAB, D_MODEL = 1000, 32

    key = jax.random.PRNGKey(0)
    k_ids, k_w = jax.random.split(key)
    ids = jax.random.randint(k_ids, (B, S), 0, VOCAB, dtype=jnp.int32)
    # nn.Embedding default init: weight ~ N(0, 1)
    weight = jax.random.normal(k_w, (VOCAB, D_MODEL), dtype=jnp.float32)
    ref = weight[ids]

    # 1) auto path: N (=16) << V (=1000) -> HBM row-gather path.
    out = jax.block_until_ready(embedder(ids, weight))
    assert out.shape == (B, S, D_MODEL)
    assert out.dtype == weight.dtype
    assert jnp.array_equal(out, ref), "HBM-gather path mismatch vs reference"

    # 2) forced VMEM-resident-table path (table easily fits VMEM).
    out_v = jax.block_until_ready(embedder(ids, weight, mode="vmem"))
    assert jnp.array_equal(out_v, ref), "VMEM-table path mismatch vs reference"

    # 3) ragged token count: exercises the padded-tail + slice path.
    ids2 = jax.random.randint(jax.random.PRNGKey(1), (3, 5), 0, VOCAB, dtype=jnp.int32)
    out2 = jax.block_until_ready(embedder(ids2, weight, mode="hbm"))
    assert jnp.array_equal(out2, weight[ids2]), "ragged-shape gather mismatch"

    print("KERNEL_OK")
</pallas_src>

<mosaic_0001>
module attributes {stable_mosaic.version = 11 : i64} {
  func.func @kernel(%arg0: i32, %arg1: memref<16xi32, #tpu.memory_space<smem>>, %arg2: memref<1000x32xf32, #tpu.memory_space<any>>, %arg3: memref<16x32xf32, #tpu.memory_space<vmem>>, %arg4: memref<16x32xf32, #tpu.memory_space<vmem>>, %arg5: memref<8x!tpu.dma_semaphore, #tpu.memory_space<semaphore_mem>>) attributes {dimension_semantics = [#tpu.dimension_semantics<parallel>], iteration_bounds = array<i64: 1>, scalar_prefetch = 1 : i64, scratch_operands = 2 : i64, tpu.core_type = #tpu.core_type<tc>, window_params = [{}, {transform_indices = @transform_1, window_bounds = array<i64: 16, 32>}]} {
    %c16_i32 = arith.constant 16 : i32
    %0 = arith.muli %arg0, %c16_i32 : i32
    %c0_i32 = arith.constant 0 : i32
    %c8_i32 = arith.constant 8 : i32
    %1 = arith.addi %c0_i32, %c8_i32 : i32
    %c1_i32 = arith.constant 1 : i32
    scf.for %arg6 = %c0_i32 to %1 step %c1_i32  : i32 {
      %6 = arith.addi %0, %arg6 : i32
      %7 = arith.index_cast %6 : i32 to index
      %8 = memref.load %arg1[%7] : memref<16xi32, #tpu.memory_space<smem>>
      %c0_i32_12 = arith.constant 0 : i32
      %c999_i32 = arith.constant 999 : i32
      %9 = arith.maxsi %c0_i32_12, %8 : i32
      %10 = arith.minsi %c999_i32, %9 : i32
      %c8_i32_13 = arith.constant 8 : i32
      %c0_i32_14 = arith.constant 0 : i32
      %11 = arith.cmpi eq, %c8_i32_13, %c0_i32_14 : i32
      %c1_i32_15 = arith.constant 1 : i32
      %12 = arith.select %11, %c1_i32_15, %c8_i32_13 : i32
      %13 = arith.remsi %arg6, %12 : i32
      %c0_i32_16 = arith.constant 0 : i32
      %14 = arith.cmpi ne, %13, %c0_i32_16 : i32
      %c0_i32_17 = arith.constant 0 : i32
      %15 = arith.cmpi slt, %13, %c0_i32_17 : i32
      %c0_i32_18 = arith.constant 0 : i32
      %16 = arith.cmpi slt, %12, %c0_i32_18 : i32
      %17 = arith.xori %15, %16 : i1
      %18 = arith.andi %17, %14 : i1
      %19 = arith.addi %13, %12 : i32
      %20 = arith.select %18, %19, %13 : i32
      %c0_i32_19 = arith.constant 0 : i32
      %21 = tpu.memref_slice %arg2[%10, %c0_i32_19] : memref<1000x32xf32, #tpu.memory_space<any>> -> memref<1x32xf32, #tpu.memory_space<any>>
      %c0_i32_20 = arith.constant 0 : i32
      %22 = tpu.memref_slice %arg4[%arg6, %c0_i32_20] : memref<16x32xf32, #tpu.memory_space<vmem>> -> memref<1x32xf32, #tpu.memory_space<vmem>>
      %23 = tpu.memref_slice %arg5[%20] : memref<8x!tpu.dma_semaphore, #tpu.memory_space<semaphore_mem>> -> memref<1x!tpu.dma_semaphore, #tpu.memory_space<semaphore_mem>>
      %24 = tpu.memref_squeeze %23 : memref<1x!tpu.dma_semaphore, #tpu.memory_space<semaphore_mem>> -> memref<!tpu.dma_semaphore, #tpu.memory_space<semaphore_mem>>
      tpu.enqueue_dma source(%21 : memref<1x32xf32, #tpu.memory_space<any>>) target(%22 : memref<1x32xf32, #tpu.memory_space<vmem>>) target_semaphore(%24 : memref<!tpu.dma_semaphore, #tpu.memory_space<semaphore_mem>>)
    }
    %c8_i32_0 = arith.constant 8 : i32
    %c8_i32_1 = arith.constant 8 : i32
    %c8_i32_2 = arith.constant 8 : i32
    %2 = arith.addi %c8_i32_1, %c8_i32_2 : i32
    %c1_i32_3 = arith.constant 1 : i32
    scf.for %arg6 = %c8_i32_1 to %2 step %c1_i32_3  : i32 {
      %c8_i32_12 = arith.constant 8 : i32
      %6 = arith.subi %arg6, %c8_i32_12 : i32
      %c8_i32_13 = arith.constant 8 : i32
      %c0_i32_14 = arith.constant 0 : i32
      %7 = arith.cmpi eq, %c8_i32_13, %c0_i32_14 : i32
      %c1_i32_15 = arith.constant 1 : i32
      %8 = arith.select %7, %c1_i32_15, %c8_i32_13 : i32
      %9 = arith.remsi %6, %8 : i32
      %c0_i32_16 = arith.constant 0 : i32
      %10 = arith.cmpi ne, %9, %c0_i32_16 : i32
      %c0_i32_17 = arith.constant 0 : i32
      %11 = arith.cmpi slt, %9, %c0_i32_17 : i32
      %c0_i32_18 = arith.constant 0 : i32
      %12 = arith.cmpi slt, %8, %c0_i32_18 : i32
      %13 = arith.xori %11, %12 : i1
      %14 = arith.andi %13, %10 : i1
      %15 = arith.addi %9, %8 : i32
      %16 = arith.select %14, %15, %9 : i32
      %c0_i32_19 = arith.constant 0 : i32
      %c0_i32_20 = arith.constant 0 : i32
      %17 = tpu.memref_slice %arg2[%c0_i32_19, %c0_i32_20] : memref<1000x32xf32, #tpu.memory_space<any>> -> memref<1x32xf32, #tpu.memory_space<any>>
      %c0_i32_21 = arith.constant 0 : i32
      %18 = tpu.memref_slice %arg4[%6, %c0_i32_21] : memref<16x32xf32, #tpu.memory_space<vmem>> -> memref<1x32xf32, #tpu.memory_space<vmem>>
      %19 = tpu.memref_slice %arg5[%16] : memref<8x!tpu.dma_semaphore, #tpu.memory_space<semaphore_mem>> -> memref<1x!tpu.dma_semaphore, #tpu.memory_space<semaphore_mem>>
      %20 = tpu.memref_squeeze %19 : memref<1x!tpu.dma_semaphore, #tpu.memory_space<semaphore_mem>> -> memref<!tpu.dma_semaphore, #tpu.memory_space<semaphore_mem>>
      tpu.wait_dma2 semaphore(%20 : memref<!tpu.dma_semaphore, #tpu.memory_space<semaphore_mem>>) src(%17 : memref<1x32xf32, #tpu.memory_space<any>>) dst(%18 : memref<1x32xf32, #tpu.memory_space<vmem>>)
      %21 = arith.addi %0, %arg6 : i32
      %22 = arith.index_cast %21 : i32 to index
      %23 = memref.load %arg1[%22] : memref<16xi32, #tpu.memory_space<smem>>
      %c0_i32_22 = arith.constant 0 : i32
      %c999_i32 = arith.constant 999 : i32
      %24 = arith.maxsi %c0_i32_22, %23 : i32
      %25 = arith.minsi %c999_i32, %24 : i32
      %c8_i32_23 = arith.constant 8 : i32
      %c0_i32_24 = arith.constant 0 : i32
      %26 = arith.cmpi eq, %c8_i32_23, %c0_i32_24 : i32
      %c1_i32_25 = arith.constant 1 : i32
      %27 = arith.select %26, %c1_i32_25, %c8_i32_23 : i32
      %28 = arith.remsi %arg6, %27 : i32
      %c0_i32_26 = arith.constant 0 : i32
      %29 = arith.cmpi ne, %28, %c0_i32_26 : i32
      %c0_i32_27 = arith.constant 0 : i32
      %30 = arith.cmpi slt, %28, %c0_i32_27 : i32
      %c0_i32_28 = arith.constant 0 : i32
      %31 = arith.cmpi slt, %27, %c0_i32_28 : i32
      %32 = arith.xori %30, %31 : i1
      %33 = arith.andi %32, %29 : i1
      %34 = arith.addi %28, %27 : i32
      %35 = arith.select %33, %34, %28 : i32
      %c0_i32_29 = arith.constant 0 : i32
      %36 = tpu.memref_slice %arg2[%25, %c0_i32_29] : memref<1000x32xf32, #tpu.memory_space<any>> -> memref<1x32xf32, #tpu.memory_space<any>>
      %c0_i32_30 = arith.constant 0 : i32
      %37 = tpu.memref_slice %arg4[%arg6, %c0_i32_30] : memref<16x32xf32, #tpu.memory_space<vmem>> -> memref<1x32xf32, #tpu.memory_space<vmem>>
      %38 = tpu.memref_slice %arg5[%35] : memref<8x!tpu.dma_semaphore, #tpu.memory_space<semaphore_mem>> -> memref<1x!tpu.dma_semaphore, #tpu.memory_space<semaphore_mem>>
      %39 = tpu.memref_squeeze %38 : memref<1x!tpu.dma_semaphore, #tpu.memory_space<semaphore_mem>> -> memref<!tpu.dma_semaphore, #tpu.memory_space<semaphore_mem>>
      tpu.enqueue_dma source(%36 : memref<1x32xf32, #tpu.memory_space<any>>) target(%37 : memref<1x32xf32, #tpu.memory_space<vmem>>) target_semaphore(%39 : memref<!tpu.dma_semaphore, #tpu.memory_space<semaphore_mem>>)
    }
    %c8_i32_4 = arith.constant 8 : i32
    %c8_i32_5 = arith.constant 8 : i32
    %c8_i32_6 = arith.constant 8 : i32
    %3 = arith.addi %c8_i32_5, %c8_i32_6 : i32
    %c1_i32_7 = arith.constant 1 : i32
    scf.for %arg6 = %c8_i32_5 to %3 step %c1_i32_7  : i32 {
      %c8_i32_12 = arith.constant 8 : i32
      %c0_i32_13 = arith.constant 0 : i32
      %6 = arith.cmpi eq, %c8_i32_12, %c0_i32_13 : i32
      %c1_i32_14 = arith.constant 1 : i32
      %7 = arith.select %6, %c1_i32_14, %c8_i32_12 : i32
      %8 = arith.remsi %arg6, %7 : i32
      %c0_i32_15 = arith.constant 0 : i32
      %9 = arith.cmpi ne, %8, %c0_i32_15 : i32
      %c0_i32_16 = arith.constant 0 : i32
      %10 = arith.cmpi slt, %8, %c0_i32_16 : i32
      %c0_i32_17 = arith.constant 0 : i32
      %11 = arith.cmpi slt, %7, %c0_i32_17 : i32
      %12 = arith.xori %10, %11 : i1
      %13 = arith.andi %12, %9 : i1
      %14 = arith.addi %8, %7 : i32
      %15 = arith.select %13, %14, %8 : i32
      %c0_i32_18 = arith.constant 0 : i32
      %c0_i32_19 = arith.constant 0 : i32
      %16 = tpu.memref_slice %arg2[%c0_i32_18, %c0_i32_19] : memref<1000x32xf32, #tpu.memory_space<any>> -> memref<1x32xf32, #tpu.memory_space<any>>
      %c0_i32_20 = arith.constant 0 : i32
      %17 = tpu.memref_slice %arg4[%arg6, %c0_i32_20] : memref<16x32xf32, #tpu.memory_space<vmem>> -> memref<1x32xf32, #tpu.memory_space<vmem>>
      %18 = tpu.memref_slice %arg5[%15] : memref<8x!tpu.dma_semaphore, #tpu.memory_space<semaphore_mem>> -> memref<1x!tpu.dma_semaphore, #tpu.memory_space<semaphore_mem>>
      %19 = tpu.memref_squeeze %18 : memref<1x!tpu.dma_semaphore, #tpu.memory_space<semaphore_mem>> -> memref<!tpu.dma_semaphore, #tpu.memory_space<semaphore_mem>>
      tpu.wait_dma2 semaphore(%19 : memref<!tpu.dma_semaphore, #tpu.memory_space<semaphore_mem>>) src(%16 : memref<1x32xf32, #tpu.memory_space<any>>) dst(%17 : memref<1x32xf32, #tpu.memory_space<vmem>>)
    }
    %c8_i32_8 = arith.constant 8 : i32
    %c0 = arith.constant 0 : index
    %c0_9 = arith.constant 0 : index
    %4 = vector.load %arg4[%c0, %c0_9] : memref<16x32xf32, #tpu.memory_space<vmem>>, vector<16x32xf32>
    %c0_10 = arith.constant 0 : index
    %c0_11 = arith.constant 0 : index
    %5 = vector.load %arg3[%c0_10, %c0_11] : memref<16x32xf32, #tpu.memory_space<vmem>>, vector<16x32xf32>
    tpu.vector_store %arg3[%c0_10, %c0_11], %4 {strides = array<i32>} : memref<16x32xf32, #tpu.memory_space<vmem>>, vector<16x32xf32>,
    return
  }
  func.func @transform_1(%arg0: i32, %arg1: memref<16xi32, #tpu.memory_space<smem>>) -> (i32, i32) {
    %c0_i32 = arith.constant 0 : i32
    %c0_i32_0 = arith.constant 0 : i32
    return %arg0, %c0_i32 : i32, i32
  }
}

</mosaic_0001>

<bundles_post_ra>
// kernel: tpu_custom_call.1
= control target key start
LH: loop header
LB: loop body
LE: loop exit
PB: predicated region body
PF: predicated region fallthrough
CT: control target
= control target key end

     0   :  { %s498_s0 = inlined_call_operand.vmem [shape: s32[16], index: 0, kind: input, shape index: {}]   ;;  %s499_s1 = inlined_call_operand.vmem [shape: f32[1000,32], index: 1, kind: input, shape index: {}]   ;;  %s500_s2 = inlined_call_operand.hbm [shape: f32[16,32], index: 2, kind: output, shape index: {}]  }
   0x1   :  { %s7_s11 = sshll.u32 %s498_s0, 4  ;;  %s8_s11 = int_to_ptr.vmem [resolvable:$true] %s7_s11 }
   0x2   :  { %s378_s12 = scalar_lea.vmem %s8_s11, 16  ;;  %p383_p1 = scmp.lt.s32.totalorder %s8_s11, %s8_s11 }
   0x3   :  { %p379_p0 = scmp.ne.s32.totalorder %s8_s11, %s378_s12  ;;  %p384_p2 = scmp.lt.s32.totalorder %s378_s12, %s378_s12 }
   0x5   :  { %p385_p3 = por %p384_p2, %p383_p1 }
   0x7   :  { %p386_p4 = pnand %p385_p3, %p379_p0 }
   0x9   :  { %389 = shalt.err (!%p386_p4)  }
   0xa   :  { %s444_s13 = smov [#allocation5]  }
   0xb   :  { %10 = dma.vmem_to_smem %s8_s11, 16, %s444_s13, [#allocation4] }
   0xc   :  { %424 = dma.done.wait [#allocation4], 16 }
   0xd   :  { %425 = vsyncadd [#allocation4], 4294967280 }
   0xe   :  { %12 = sfence }
   0xf   :  { %13 = vsyncpa [#allocation7], 0  ;;  %s432_s14 = smov 0  }
  0x10 LB: > { %s22_s15 = sld [smem:[#allocation5 + %s434_s14]]  ;;  %p27_p5 = scmp.lt.s32.totalorder %s434_s14, 0  ;;  %s434_s14 = sphi %s432_s14, %s20_s14  }
  0x11   : > { %s28_s0 = ssub.s32 0, %s434_s14  ;;  %s40_s23 = scalar_lea.vmem [#allocation2], %s434_s14 }
  0x12   : > { %s320_s16 = smin.u32 %s434_s14, %s28_s0 }
  0x13   : > { %s30_s17 = sand.u32 7, %s320_s16  }
  0x14   : > { %s31_s18 = ssub.s32 0, %s30_s17 }
  0x15   : > { %s502_s18 = smov (!%p27_p5, %s31_s18), %s30_s17 }
  0x16   : > { %p23_p6 = scmp.gt.s32.totalorder %s22_s15, 0  ;;  %p315_p7 = scmp.lt.s32.totalorder %s22_s15, 999 }
  0x17   : > { %p322_p8 = scmp.lt.s32.totalorder %s502_s18, 0  ;;  %s37_s19 = sadd.s32 8, %s502_s18 }
  0x18   : > { %s504_s15 = smov (!%p23_p6, %s22_s15), 0 }
  0x19   : > { %s506_s19 = smov (!%p322_p8, %s37_s19), %s502_s18  ;;  %s508_s15 = smov (!%p315_p7, %s504_s15), 999 }
  0x1a   : > { %s39_s22 = scalar_lea.vmem %s499_s1, %s508_s15  ;;  %s41_s24 = scalar_lea.sflag [#allocation3], %s506_s19 }
  0x1b   : > { %v59_v0 = vld [vmem:[%s39_s22] sm:$0x1] }
  0x1c   : > { %60 = vst [vmem:[%s40_s23] sm:$0x1] %v59_v0 }
  0x1d   : > { %85 = vsyncadd %s41_s24, 16  ;;  %s20_s14 = sadd.s32 1, %s434_s14  }
  0x1e   : > { %p17_p9 = scmp.ge.s32.totalorder %s20_s14, 8  }
  0x1f   :  { %s469_s25 = smov (%p17_p9), 8  }
  0x20   :  { %19 = sbr.rel (!%p17_p9) target bundleno = 16 (0x10), region = 136 }
  0x27 LB: > { %s323_s26 = sadd.s32 4294967288, %s438_s25  ;;  %s438_s25 = sphi %s469_s25, %s91_s25  }
  0x28   : > { %p93_p10 = scmp.lt.s32.totalorder %s323_s26, 0  ;;  %s94_s27 = ssub.s32 0, %s323_s26 }
  0x29   : > { %s324_s28 = smin.u32 %s323_s26, %s94_s27 }
  0x2a   : > { %s96_s29 = sand.u32 7, %s324_s28  }
  0x2b   : > { %s97_s30 = ssub.s32 0, %s96_s29 }
  0x2c   : > { %s510_s30 = smov (!%p93_p10, %s97_s30), %s96_s29 }
  0x2d   : > { %p326_p11 = scmp.lt.s32.totalorder %s510_s30, 0  ;;  %s103_s3 = sadd.s32 8, %s510_s30 }
  0x2f   : > { %s512_s3 = smov (!%p326_p11, %s103_s3), %s510_s30 }
  0x30   : > { %s105_s4 = scalar_lea.sflag [#allocation3], %s512_s3 }
  0x31   : > { %426 = dma.done.wait %s105_s4, 16 }
  0x32   : > { %427 = vsyncadd %s105_s4, 4294967280  ;;  %p115_p12 = scmp.lt.s32.totalorder %s438_s25, 0  ;;  %s116_s5 = ssub.s32 0, %s438_s25 }
  0x33   : > { %s110_s6 = sld [smem:[#allocation5 + %s438_s25]]  ;;  %s332_s7 = smin.u32 %s438_s25, %s116_s5 }
  0x34   : > { %s118_s8 = sand.u32 7, %s332_s7   ;;  %s128_s14 = scalar_lea.vmem [#allocation2], %s438_s25 }
  0x35   : > { %s119_s9 = ssub.s32 0, %s118_s8 }
  0x36   : > { %s514_s9 = smov (!%p115_p12, %s119_s9), %s118_s8 }
  0x37   : > { %p334_p13 = scmp.lt.s32.totalorder %s514_s9, 0  ;;  %s125_s10 = sadd.s32 8, %s514_s9 }
  0x39   : > { %p111_p0 = scmp.gt.s32.totalorder %s110_s6, 0  ;;  %p327_p1 = scmp.lt.s32.totalorder %s110_s6, 999 }
  0x3a   : > { %s516_s10 = smov (!%p334_p13, %s125_s10), %s514_s9 }
  0x3b   : > { %s518_s6 = smov (!%p111_p0, %s110_s6), 0  ;;  %s129_s15 = scalar_lea.sflag [#allocation3], %s516_s10 }
  0x3c   : > { %s520_s6 = smov (!%p327_p1, %s518_s6), 999 }
  0x3d   : > { %s127_s13 = scalar_lea.vmem %s499_s1, %s520_s6 }
  0x3e   : > { %v147_v1 = vld [vmem:[%s127_s13] sm:$0x1] }
  0x3f   : > { %148 = vst [vmem:[%s128_s14] sm:$0x1] %v147_v1 }
  0x40   : > { %173 = vsyncadd %s129_s15, 16  ;;  %s91_s25 = sadd.s32 1, %s438_s25  }
  0x41   : > { %p88_p2 = scmp.ge.s32.totalorder %s91_s25, 16  }
  0x42   :  { %s440_s0 = smov (%p88_p2), 8  }
  0x43   :  { %90 = sbr.rel (!%p88_p2) target bundleno = 39 (0x27), region = 147 }
  0x4a LB: > { %p180_p3 = scmp.lt.s32.totalorder %s442_s0, 0  ;;  %s181_s16 = ssub.s32 0, %s442_s0  ;;  %s442_s0 = sphi %s440_s0, %s179_s0  }
  0x4b   : > { %s335_s17 = smin.u32 %s442_s0, %s181_s16 }
  0x4c   : > { %s183_s18 = sand.u32 7, %s335_s17  }
  0x4d   : > { %s184_s19 = ssub.s32 0, %s183_s18 }
  0x4e   : > { %s522_s19 = smov (!%p180_p3, %s184_s19), %s183_s18 }
  0x4f   : > { %p337_p4 = scmp.lt.s32.totalorder %s522_s19, 0  ;;  %s190_s20 = sadd.s32 8, %s522_s19 }
  0x51   : > { %s524_s20 = smov (!%p337_p4, %s190_s20), %s522_s19 }
  0x52   : > { %s192_s21 = scalar_lea.sflag [#allocation3], %s524_s20 }
  0x53   : > { %428 = dma.done.wait %s192_s21, 16 }
  0x54   : > { %429 = vsyncadd %s192_s21, 4294967280  ;;  %s179_s0 = sadd.s32 1, %s442_s0  }
  0x55   : > { %p176_p5 = scmp.ge.s32.totalorder %s179_s0, 16  }
  0x56   :  { %v196_v2 = vld [vmem:[#allocation2] sm:$0xff] (%p176_p5)  ;;  %vm198_vm0 = vcmask (%p176_p5), 261120   ;;  %v197_v3 = vld [vmem:[#allocation2 + $0x8] sm:$0xff] (%p176_p5)  ;;  %s445_s1 = smov (%p176_p5), [#allocation6]  }
  0x57   :  { %178 = sbr.rel (!%p176_p5) target bundleno = 74 (0x4a), region = 158  ;;  %199 = vst.msk [vmem:[#allocation6] sm:$0xff] (%p176_p5), %vm198_vm0, %v196_v2  ;;  %200 = vst.msk [vmem:[#allocation6 + $0x8] sm:$0xff] (%p176_p5), %vm198_vm0, %v197_v3  ;;  %s206_s22 = sshll.u32 (%p176_p5), %s445_s1, 4  ;;  %s207_s22 = int_to_ptr.vmem [resolvable:$true] %s206_s22 }
  0x58   :  { %s390_s23 = scalar_lea.vmem (%p176_p5), %s207_s22, 256  ;;  %p395_p7 = scmp.lt.s32.totalorder (%p176_p5), %s207_s22, %s207_s22 }
  0x59   :  { %p391_p6 = scmp.ne.s32.totalorder (%p176_p5), %s207_s22, %s390_s23  ;;  %p396_p8 = scmp.lt.s32.totalorder (%p176_p5), %s390_s23, %s390_s23 }
  0x5b   :  { %p397_p9 = por (%p176_p5), %p396_p8, %p395_p7 }
  0x5d   :  { %p398_p10 = pnand (%p176_p5), %p397_p9, %p391_p6 }
  0x5f   :  { %401 = shalt.err (!%p398_p10)
}
  0x60   :  { %s402_s26 = scalar_lea.hbm %s500_s2, 256 }
  0x61   :  { %p403_p11 = scmp.ne.s32.totalorder %s500_s2, %s402_s26  ;;  %p406_p12 = scmp.lt.u32.totalorder %s402_s26, %s500_s2 }
  0x63   :  { %p408_p13 = pnand %p406_p12, %p403_p11 }
  0x65   :  { %411 = shalt.err (!%p408_p13)
}
  0x66   :  { %s446_s3 = smov 128   ;;  %s447_s4 = smov 8  }
  0x67   :  { %212 = dma.vmem_to_hbm [thread:$0]  %s207_s22, 256, %s500_s2, [#allocation7], %s446_s3, %s446_s3, %s447_s4  }
  0x68   :  { %430 = dma.done.wait [#allocation7], 256  }
  0x69   :  { %431 = vsyncadd [#allocation7], 4294967040 }
  0x6a   :  { %216 = vsyncpa [#allocation7], 1 }
  0x6b   :  { %217 = vsyncmov [#allocation3] }
  0x6e   :  { %s218_s7 = vpop.sfrf %217 }
  0x6f   :  { %p338_p0 = scmp.ne.s32.totalorder %s218_s7, 0 }
  0x71   :  { %222 = shalt.err (%p338_p0)  }
  0x72   :  { %224 = vsyncmov [#allocation3 + $0x1] }
  0x75   :  { %s225_s8 = vpop.sfrf %224 }
  0x76   :  { %p339_p1 = scmp.ne.s32.totalorder %s225_s8, 0 }
  0x78   :  { %229 = shalt.err (%p339_p1)  }
  0x79   :  { %231 = vsyncmov [#allocation3 + $0x2] }
  0x7c   :  { %s232_s9 = vpop.sfrf %231 }
  0x7d   :  { %p340_p2 = scmp.ne.s32.totalorder %s232_s9, 0 }
  0x7f   :  { %236 = shalt.err (%p340_p2)  }
  0x80   :  { %238 = vsyncmov [#allocation3 + $0x3] }
  0x83   :  { %s239_s10 = vpop.sfrf %238 }
  0x84   :  { %p341_p3 = scmp.ne.s32.totalorder %s239_s10, 0 }
  0x86   :  { %243 = shalt.err (%p341_p3)  }
  0x87   :  { %245 = vsyncmov [#allocation3 + $0x4] }
  0x8a   :  { %s246_s2 = vpop.sfrf %245 }
  0x8b   :  { %p342_p4 = scmp.ne.s32.totalorder %s246_s2, 0 }
  0x8d   :  { %250 = shalt.err (%p342_p4)  }
  0x8e   :  { %252 = vsyncmov [#allocation3 + $0x5] }
  0x91   :  { %s253_s11 = vpop.sfrf %252 }
  0x92   :  { %p343_p5 = scmp.ne.s32.totalorder %s253_s11, 0 }
  0x94   :  { %257 = shalt.err (%p343_p5)  }
  0x95   :  { %259 = vsyncmov [#allocation3 + $0x6] }
  0x98   :  { %s260_s12 = vpop.sfrf %259 }
  0x99   :  { %p344_p6 = scmp.ne.s32.totalorder %s260_s12, 0 }
  0x9b   :  { %264 = shalt.err (%p344_p6)  }
  0x9c   :  { %266 = vsyncmov [#allocation3 + $0x7] }
  0x9f   :  { %s267_s13 = vpop.sfrf %266 }
  0xa0   :  { %p345_p7 = scmp.ne.s32.totalorder %s267_s13, 0 }
  0xa2   :  { %271 = shalt.err (%p345_p7)  }

</bundles_post_ra>
